<compile_context>
chip_gen: v5e
topology: v5e:2x2
jax: 0.10.0
libtpu: 0.0.40
codegen_flags: <defaults>
</compile_context>

<pallas_src>
import functools
import math

import jax
import jax.numpy as jnp
import numpy as np
from jax import lax
from jax.experimental import pallas as pl
from jax.experimental.pallas import tpu as pltpu


def _alignment_kernel(temp_ref, a_ref, b_ref, va_ref, vb_ref,
                      fa_ref, fb_ref, m_scr, l_scr, fb_acc,
                      *, compute_dtype, approx_recip):
    """One grid step = (batch block i, La tile t).  Grid: (B/BB, La/TLa).

      a_ref : (BB, TLa, Hp)   b_ref : (BB, Lb, Hp)   (b is block-invariant in t)
      va_ref: (BB, TLa, 1)    vb_ref: (BB, 1, Lb)    token validity (!=0 == valid)
      fa_ref: (BB, TLa, Hp)   feature_a tile (written every step)
      fb_ref: (BB, Lb, Hp)    feature_b (block resident across t, written at last t)
      m_scr, l_scr: (BB, 1, Lb) f32   running column max / sum (softmax over La)
      fb_acc: (BB, Lb, Hp) f32        running unnormalized feature_b
    """
    t = pl.program_id(1)

    @pl.when(t == 0)
    def _():
        m_scr[...] = jnp.full_like(m_scr, -jnp.inf)
        l_scr[...] = jnp.zeros_like(l_scr)
        fb_acc[...] = jnp.zeros_like(fb_acc)

    a = a_ref[...]
    b = b_ref[...]
    if a.dtype != compute_dtype:
        a = a.astype(compute_dtype)
        b = b.astype(compute_dtype)

    # attn tile = (a @ b^T) * temperature, masked with the outer AND of token
    # validity (replaces the reference's mask_a @ mask_b^T matmul).
    s = lax.dot_general(a, b, (((2,), (2,)), ((0,), (0,))),
                        preferred_element_type=jnp.float32) * temp_ref[0]
    valid = (va_ref[...] != 0.0) & (vb_ref[...] != 0.0)          # (BB, TLa, Lb)
    s = jnp.where(valid, s, jnp.float32(-10000000.0))

    # ---- softmax over Lb (dim=2): local to this La tile -> feature_a tile.
    m_b = jnp.max(s, axis=2, keepdims=True)                      # (BB, TLa, 1)
    e_b = jnp.exp(s - m_b)
    inv_b = pl.reciprocal(jnp.sum(e_b, axis=2, keepdims=True), approx=approx_recip)
    attn_b = (e_b * inv_b).astype(a.dtype)
    fa = lax.dot_general(attn_b, b, (((2,), (1,)), ((0,), (0,))),
                         preferred_element_type=jnp.float32)     # (BB, TLa, Hp)
    fa_ref[...] = fa.astype(fa_ref.dtype)

    # ---- softmax over La (dim=1): flash-style online accumulation across La
    # tiles -> feature_b.  A fully masked column ends as exp(0)=1 per row,
    # i.e. exactly the reference's uniform softmax.
    m_prev = m_scr[...]                                          # (BB, 1, Lb)
    m_new = jnp.maximum(m_prev, jnp.max(s, axis=1, keepdims=True))
    alpha = jnp.exp(m_prev - m_new)                              # 0 at t == 0
    p = jnp.exp(s - m_new)                                       # (BB, TLa, Lb)
    l_scr[...] = alpha * l_scr[...] + jnp.sum(p, axis=1, keepdims=True)
    m_scr[...] = m_new
    pb = lax.dot_general(p.astype(a.dtype), a, (((1,), (1,)), ((0,), (0,))),
                         preferred_element_type=jnp.float32)     # (BB, Lb, Hp)
    fb_acc[...] = jnp.swapaxes(alpha, 1, 2) * fb_acc[...] + pb

    @pl.when(t == pl.num_programs(1) - 1)
    def _():
        inv_l = pl.reciprocal(l_scr[...], approx=approx_recip)   # (BB, 1, Lb)
        fb_ref[...] = (fb_acc[...] * jnp.swapaxes(inv_l, 1, 2)).astype(fb_ref.dtype)


def _round_up(x, m):
    return ((x + m - 1) // m) * m


def _vmem_capacity_bytes():
    try:
        info = pltpu.get_tpu_info()
        cap = getattr(info, "vmem_capacity_bytes", None)
        if cap:
            return int(cap)
    except Exception:
        pass
    return 64 * 1024 * 1024   # conservative: v7x per-TensorCore VMEM


def _step_vmem_bytes(bb, tla, Lb, Hp, in_isz, out_isz):
    """Rough per-grid-step footprint: double-buffered blocks + scratch + live f32."""
    lane = 128
    lb_pad = _round_up(Lb, lane)
    a_blk = bb * tla * Hp * in_isz
    b_blk = bb * Lb * Hp * in_isz
    va_blk = bb * _round_up(tla, 8) * lane * 4
    vb_blk = bb * 8 * lb_pad * 4
    fa_blk = bb * tla * Hp * out_isz
    fb_blk = bb * Lb * Hp * out_isz
    blocks = 2 * (a_blk + b_blk + va_blk + vb_blk + fa_blk + fb_blk)
    scratch = bb * Lb * Hp * 4 + 2 * bb * 8 * lb_pad * 4
    live = 3 * bb * tla * lb_pad * 4 + bb * (tla + Lb) * Hp * 4
    return blocks + scratch + live


def _pick_blocks(B, La, Lb, Hp, in_isz, out_isz, budget):
    """Largest (batch_block, la_block) whose per-step footprint fits `budget`.
    Prefers an untiled La (no online-softmax overhead), then the largest batch
    block that still leaves >= 2 batch grid steps when B >= 2 (so both v7x
    TensorCores get 'parallel' work)."""
    la_cands = [La] + sorted((t for t in range(8, La, 8) if La % t == 0),
                             reverse=True)
    bb_all = sorted((d for d in range(1, B + 1) if B % d == 0), reverse=True)
    bb_pref = [d for d in bb_all if B // d >= 2] or bb_all
    for tla in la_cands:
        for bb in bb_pref:
            if _step_vmem_bytes(bb, tla, Lb, Hp, in_isz, out_isz) <= budget:
                return bb, tla
    # Nothing fits cleanly: smallest footprint, let the compiler try.
    # TODO(synk): add Lb tiling for extremely long b sequences.
    return 1, la_cands[-1]


def alignment_forward(a, b, mask_a, mask_b, temperature, *,
                      out_dtype=None, compute_dtype=None,
                      batch_block=None, la_block=None):
    """feature_a, feature_b = Alignment.forward(a, b, mask_a, mask_b).

      a, b          : (B, La, H), (B, Lb, H)
      mask_a, mask_b: (B, La, H), (B, Lb, H) binary masks (constant over H)
      temperature   : scalar / (1,) parameter
      out_dtype     : output dtype (default: a.dtype)
      compute_dtype : dtype fed to the MXU (default: a.dtype); pass
                      jnp.bfloat16 to run f32 inputs at native MXU rate.
    """
    B, La, H = a.shape
    Lb = b.shape[1]
    out_dtype = jnp.dtype(a.dtype if out_dtype is None else out_dtype)
    eff_dtype = jnp.dtype(a.dtype if compute_dtype is None else compute_dtype)
    approx_recip = eff_dtype != jnp.dtype(jnp.float32)

    temperature = jnp.asarray(temperature, jnp.float32).reshape((1,))

    # Per-token validity replaces the (mask_a @ mask_b^T) matmul; exact for
    # binary masks broadcast over H (the module's documented use).
    # TODO(synk): the reference's uint8 .byte() wrap-around (inner product a
    # nonzero multiple of 256) and per-feature masks with disjoint support are
    # not reproduced.
    valid_a = jnp.any(mask_a != 0, axis=-1, keepdims=True).astype(jnp.float32)   # (B, La, 1)
    valid_b = jnp.any(mask_b != 0, axis=-1)[:, None, :].astype(jnp.float32)      # (B, 1, Lb)

    # Lane-dense layout: pad H to a multiple of 128 (exact; sliced off below).
    Hp = _round_up(H, 128)
    if Hp != H:
        pad = ((0, 0), (0, 0), (0, Hp - H))
        a_p = jnp.pad(a, pad)
        b_p = jnp.pad(b, pad)
    else:
        a_p, b_p = a, b

    in_isz = jnp.dtype(a.dtype).itemsize
    out_isz = out_dtype.itemsize

    vmem_cap = _vmem_capacity_bytes()
    budget = min(vmem_cap // 3, 40 * 1024 * 1024)

    bb, tla = _pick_blocks(B, La, Lb, Hp, in_isz, out_isz, budget)
    if batch_block is not None:
        if B % batch_block:
            raise ValueError("batch_block must divide the batch size")
        bb = batch_block
    if la_block is not None:
        if La % la_block or (la_block % 8 and la_block != La):
            raise ValueError("la_block must divide La and be a multiple of 8")
        tla = la_block

    est = _step_vmem_bytes(bb, tla, Lb, Hp, in_isz, out_isz)
    vmem_limit = int(min(0.75 * vmem_cap,
                         max(32 * 1024 * 1024, 3 * est + (8 << 20))))

    grid = (B // bb, La // tla)

    cost = pl.CostEstimate(
        flops=6 * B * La * Lb * Hp,             # attn + two feature matmuls
        transcendentals=2 * B * La * Lb,        # two exps over the attn tile
        bytes_accessed=(B * (La + Lb) * Hp * (in_isz + out_isz)
                        + B * (La + Lb) * 4),
    )

    kernel = functools.partial(_alignment_kernel,
                               compute_dtype=eff_dtype,
                               approx_recip=bool(approx_recip))

    grid_spec = pltpu.PrefetchScalarGridSpec(
        num_scalar_prefetch=0,
        grid=grid,
        in_specs=[
            pl.BlockSpec(memory_space=pltpu.MemorySpace.SMEM),         # temperature (1,)
            pl.BlockSpec((bb, tla, Hp), lambda i, t: (i, t, 0)),       # a
            pl.BlockSpec((bb, Lb, Hp), lambda i, t: (i, 0, 0)),        # b (t-invariant)
            pl.BlockSpec((bb, tla, 1), lambda i, t: (i, t, 0)),        # valid_a
            pl.BlockSpec((bb, 1, Lb), lambda i, t: (i, 0, 0)),         # valid_b
        ],
        out_specs=[
            pl.BlockSpec((bb, tla, Hp), lambda i, t: (i, t, 0)),       # feature_a
            pl.BlockSpec((bb, Lb, Hp), lambda i, t: (i, 0, 0)),        # feature_b (resident over t)
        ],
        scratch_shapes=[
            pltpu.VMEM((bb, 1, Lb), jnp.float32),                      # running column max
            pltpu.VMEM((bb, 1, Lb), jnp.float32),                      # running column sum
            pltpu.VMEM((bb, Lb, Hp), jnp.float32),                     # feature_b accumulator
        ],
    )

    fa_full, fb_full = pl.pallas_call(
        kernel,
        grid_spec=grid_spec,
        out_shape=(jax.ShapeDtypeStruct((B, La, Hp), out_dtype),
                   jax.ShapeDtypeStruct((B, Lb, Hp), out_dtype)),
        compiler_params=pltpu.CompilerParams(
            dimension_semantics=("parallel", "arbitrary"),
            vmem_limit_bytes=vmem_limit),
        cost_estimate=cost,
    )(temperature, a_p, b_p, valid_a, valid_b)

    if Hp != H:
        fa_full = fa_full[:, :, :H]
        fb_full = fb_full[:, :, :H]
    return fa_full, fb_full


def alignment_ref(a, b, mask_a, mask_b, temperature):
    """Pure-JAX reference mirroring the PyTorch forward."""
    attn = jnp.einsum("bih,bjh->bij", a, b) * temperature[0]
    mprod = jnp.einsum("bih,bjh->bij", mask_a.astype(jnp.float32),
                       mask_b.astype(jnp.float32))
    attn = jnp.where(mprod != 0.0, attn, -10000000.0)
    attn_a = jax.nn.softmax(attn, axis=1)
    attn_b = jax.nn.softmax(attn, axis=2)
    feature_b = jnp.einsum("bij,bih->bjh", attn_a, a)
    feature_a = jnp.einsum("bij,bjh->bih", attn_b, b)
    return feature_a, feature_b


if __name__ == "__main__":
    key = jax.random.PRNGKey(0)
    B, La, Lb, H = 2, 16, 8, 32

    k1, k2, k3, k4 = jax.random.split(key, 4)
    a = jax.random.normal(k1, (B, La, H), dtype=jnp.float32)
    b = jax.random.normal(k2, (B, Lb, H), dtype=jnp.float32)
    # Binary token-validity masks broadcast over the hidden dim, as the module's
    # docstring specifies (B, L, H) masks.
    mask_a = (jax.random.uniform(k3, (B, La, 1)) > 0.2).astype(jnp.float32) * jnp.ones((1, 1, H), jnp.float32)
    mask_b = (jax.random.uniform(k4, (B, Lb, 1)) > 0.2).astype(jnp.float32) * jnp.ones((1, 1, H), jnp.float32)

    # Parameter init as in __init__: temperature = 1 / sqrt(hidden_size).
    temperature = jnp.array([1.0 / math.sqrt(H)], dtype=jnp.float32)

    ref_a, ref_b = alignment_ref(a, b, mask_a, mask_b, temperature)

    # 1) Default blocking (single La tile, f32 compute, exact reciprocal).
    fa1, fb1 = alignment_forward(a, b, mask_a, mask_b, temperature)
    jax.block_until_ready((fa1, fb1))
    assert np.allclose(np.asarray(fa1), np.asarray(ref_a), atol=5e-4, rtol=5e-4)
    assert np.allclose(np.asarray(fb1), np.asarray(ref_b), atol=5e-4, rtol=5e-4)

    # 2) Forced La tiling (exercises the flash-style online softmax over La)
    #    and a >1-step batch grid.
    fa2, fb2 = alignment_forward(a, b, mask_a, mask_b, temperature,
                                 batch_block=1, la_block=8)
    jax.block_until_ready((fa2, fb2))
    assert np.allclose(np.asarray(fa2), np.asarray(ref_a), atol=5e-4, rtol=5e-4)
    assert np.allclose(np.asarray(fb2), np.asarray(ref_b), atol=5e-4, rtol=5e-4)

    # 3) bf16 compute path (native-rate MXU + EUP approximate reciprocal).
    fa3, fb3 = alignment_forward(a, b, mask_a, mask_b, temperature,
                                 compute_dtype=jnp.bfloat16)
    jax.block_until_ready((fa3, fb3))
    assert np.allclose(np.asarray(fa3), np.asarray(ref_a), atol=5e-2, rtol=5e-2)
    assert np.allclose(np.asarray(fb3), np.asarray(ref_b), atol=5e-2, rtol=5e-2)

    print("KERNEL_OK")
</pallas_src>

<mosaic_0001>
module attributes {stable_mosaic.version = 11 : i64} {
  func.func @_alignment_kernel(%arg0: i32, %arg1: i32, %arg2: memref<1xf32, #tpu.memory_space<smem>>, %arg3: memref<1x16x128xf32, #tpu.memory_space<vmem>>, %arg4: memref<1x8x128xf32, #tpu.memory_space<vmem>>, %arg5: memref<1x16x1xf32, #tpu.memory_space<vmem>>, %arg6: memref<1x1x8xf32, #tpu.memory_space<vmem>>, %arg7: memref<1x16x128xf32, #tpu.memory_space<vmem>>, %arg8: memref<1x8x128xf32, #tpu.memory_space<vmem>>, %arg9: memref<1x1x8xf32, #tpu.memory_space<vmem>>, %arg10: memref<1x1x8xf32, #tpu.memory_space<vmem>>, %arg11: memref<1x8x128xf32, #tpu.memory_space<vmem>>) attributes {dimension_semantics = [#tpu.dimension_semantics<parallel>, #tpu.dimension_semantics<arbitrary>], iteration_bounds = array<i64: 2, 1>, scalar_prefetch = 0 : i64, scratch_operands = 3 : i64, tpu.core_type = #tpu.core_type<tc>, window_params = [{transform_indices = @transform_0, window_bounds = array<i64: 1>}, {transform_indices = @transform_1, window_bounds = array<i64: 1, 16, 128>}, {transform_indices = @transform_2, window_bounds = array<i64: 1, 8, 128>}, {transform_indices = @transform_3, window_bounds = array<i64: 1, 16, 1>}, {transform_indices = @transform_4, window_bounds = array<i64: 1, 1, 8>}, {transform_indices = @transform_5, window_bounds = array<i64: 1, 16, 128>}, {transform_indices = @transform_6, window_bounds = array<i64: 1, 8, 128>}]} {
    %c0_i32 = arith.constant 0 : i32
    %0 = arith.cmpi eq, %arg1, %c0_i32 : i32
    %1 = arith.extui %0 : i1 to i32
    %c0_i32_0 = arith.constant 0 : i32
    %2 = arith.cmpi ne, %1, %c0_i32_0 : i32
    scf.if %2 {
      %cst_45 = arith.constant 0xFF800000 : f32
      %58 = vector.broadcast %cst_45 : f32 to vector<1x1x8xf32>
      %c0_46 = arith.constant 0 : index
      %c0_47 = arith.constant 0 : index
      %c0_48 = arith.constant 0 : index
      %59 = vector.load %arg9[%c0_46, %c0_47, %c0_48] : memref<1x1x8xf32, #tpu.memory_space<vmem>>, vector<1x1x8xf32>
      tpu.vector_store %arg9[%c0_46, %c0_47, %c0_48], %58 {strides = array<i32>} : memref<1x1x8xf32, #tpu.memory_space<vmem>>, vector<1x1x8xf32>,
      %cst_49 = arith.constant 0.000000e+00 : f32
      %60 = vector.broadcast %cst_49 : f32 to vector<1x1x8xf32>
      %c0_50 = arith.constant 0 : index
      %c0_51 = arith.constant 0 : index
      %c0_52 = arith.constant 0 : index
      %61 = vector.load %arg10[%c0_50, %c0_51, %c0_52] : memref<1x1x8xf32, #tpu.memory_space<vmem>>, vector<1x1x8xf32>
      tpu.vector_store %arg10[%c0_50, %c0_51, %c0_52], %60 {strides = array<i32>} : memref<1x1x8xf32, #tpu.memory_space<vmem>>, vector<1x1x8xf32>,
      %cst_53 = arith.constant 0.000000e+00 : f32
      %62 = vector.broadcast %cst_53 : f32 to vector<1x8x128xf32>
      %c0_54 = arith.constant 0 : index
      %c0_55 = arith.constant 0 : index
      %c0_56 = arith.constant 0 : index
      %63 = vector.load %arg11[%c0_54, %c0_55, %c0_56] : memref<1x8x128xf32, #tpu.memory_space<vmem>>, vector<1x8x128xf32>
      tpu.vector_store %arg11[%c0_54, %c0_55, %c0_56], %62 {strides = array<i32>} : memref<1x8x128xf32, #tpu.memory_space<vmem>>, vector<1x8x128xf32>,
    } else {
    }
    %c0 = arith.constant 0 : index
    %c0_1 = arith.constant 0 : index
    %c0_2 = arith.constant 0 : index
    %3 = vector.load %arg3[%c0, %c0_1, %c0_2] : memref<1x16x128xf32, #tpu.memory_space<vmem>>, vector<1x16x128xf32>
    %c0_3 = arith.constant 0 : index
    %c0_4 = arith.constant 0 : index
    %c0_5 = arith.constant 0 : index
    %4 = vector.load %arg4[%c0_3, %c0_4, %c0_5] : memref<1x8x128xf32, #tpu.memory_space<vmem>>, vector<1x8x128xf32>
    %cst = arith.constant dense<0.000000e+00> : vector<1x16x8xf32>
    %5 = tpu.matmul %3, %4, %cst {dimension_numbers = #tpu.dot_dimension_numbers<[2], [2], [1], [1], [0, 0, 0, 1, 1, 1], [0], [0]>} : vector<1x16x128xf32>, vector<1x8x128xf32>, vector<1x16x8xf32> -> vector<1x16x8xf32>
    %c0_6 = arith.constant 0 : index
    %6 = memref.load %arg2[%c0_6] : memref<1xf32, #tpu.memory_space<smem>>
    %7 = vector.broadcast %6 : f32 to vector<1x16x8xf32>
    %8 = arith.mulf %5, %7 : vector<1x16x8xf32>
    %c0_7 = arith.constant 0 : index
    %c0_8 = arith.constant 0 : index
    %c0_9 = arith.constant 0 : index
    %9 = vector.load %arg5[%c0_7, %c0_8, %c0_9] : memref<1x16x1xf32, #tpu.memory_space<vmem>>, vector<1x16x1xf32>
    %cst_10 = arith.constant 0.000000e+00 : f32
    %10 = vector.broadcast %cst_10 : f32 to vector<1x16x1xf32>
    %11 = arith.cmpf one, %9, %10 : vector<1x16x1xf32>
    %c0_11 = arith.constant 0 : index
    %c0_12 = arith.constant 0 : index
    %c0_13 = arith.constant 0 : index
    %12 = vector.load %arg6[%c0_11, %c0_12, %c0_13] : memref<1x1x8xf32, #tpu.memory_space<vmem>>, vector<1x1x8xf32>
    %cst_14 = arith.constant 0.000000e+00 : f32
    %13 = vector.broadcast %cst_14 : f32 to vector<1x1x8xf32>
    %14 = arith.cmpf one, %12, %13 : vector<1x1x8xf32>
    %15 = vector.broadcast %11 : vector<1x16x1xi1> to vector<1x16x8xi1>
    %16 = vector.broadcast %14 : vector<1x1x8xi1> to vector<1x16x8xi1>
    %17 = arith.andi %15, %16 : vector<1x16x8xi1>
    %cst_15 = arith.constant -1.000000e+07 : f32
    %18 = vector.broadcast %cst_15 : f32 to vector<1x16x8xf32>
    %19 = arith.select %17, %8, %18 : vector<1x16x8xi1>, vector<1x16x8xf32>
    %cst_16 = arith.constant dense<0xFF800000> : vector<1x16xf32>
    %20 = vector.multi_reduction <maximumf>, %19, %cst_16 [2] : vector<1x16x8xf32> to vector<1x16xf32>
    %21 = vector.shape_cast %20 : vector<1x16xf32> to vector<1x16x1xf32>
    %22 = vector.broadcast %21 : vector<1x16x1xf32> to vector<1x16x8xf32>
    %23 = arith.subf %19, %22 : vector<1x16x8xf32>
    %24 = math.exp %23 : vector<1x16x8xf32>
    %cst_17 = arith.constant dense<0.000000e+00> : vector<1x16xf32>
    %25 = vector.multi_reduction <add>, %24, %cst_17 [2] : vector<1x16x8xf32> to vector<1x16xf32>
    %26 = vector.shape_cast %25 : vector<1x16xf32> to vector<1x16x1xf32>
    %27 = tpu.reciprocal %26 : vector<1x16x1xf32> -> vector<1x16x1xf32>
    %28 = vector.broadcast %27 : vector<1x16x1xf32> to vector<1x16x8xf32>
    %29 = arith.mulf %24, %28 : vector<1x16x8xf32>
    %cst_18 = arith.constant dense<0.000000e+00> : vector<1x16x128xf32>
    %30 = tpu.matmul %29, %4, %cst_18 {dimension_numbers = #tpu.dot_dimension_numbers<[2], [1], [1], [2], [0, 0, 0, 1, 1, 2], [0], [0]>} : vector<1x16x8xf32>, vector<1x8x128xf32>, vector<1x16x128xf32> -> vector<1x16x128xf32>
    %c0_19 = arith.constant 0 : index
    %c0_20 = arith.constant 0 : index
    %c0_21 = arith.constant 0 : index
    %31 = vector.load %arg7[%c0_19, %c0_20, %c0_21] : memref<1x16x128xf32, #tpu.memory_space<vmem>>, vector<1x16x128xf32>
    tpu.vector_store %arg7[%c0_19, %c0_20, %c0_21], %30 {strides = array<i32>} : memref<1x16x128xf32, #tpu.memory_space<vmem>>, vector<1x16x128xf32>,
    %c0_22 = arith.constant 0 : index
    %c0_23 = arith.constant 0 : index
    %c0_24 = arith.constant 0 : index
    %32 = vector.load %arg9[%c0_22, %c0_23, %c0_24] : memref<1x1x8xf32, #tpu.memory_space<vmem>>, vector<1x1x8xf32>
    %cst_25 = arith.constant dense<0xFF800000> : vector<1x8xf32>
    %33 = vector.multi_reduction <maximumf>, %19, %cst_25 [1] : vector<1x16x8xf32> to vector<1x8xf32>
    %34 = vector.shape_cast %33 : vector<1x8xf32> to vector<1x1x8xf32>
    %35 = arith.maximumf %32, %34 : vector<1x1x8xf32>
    %36 = arith.subf %32, %35 : vector<1x1x8xf32>
    %37 = math.exp %36 : vector<1x1x8xf32>
    %38 = vector.broadcast %35 : vector<1x1x8xf32> to vector<1x16x8xf32>
    %39 = arith.subf %19, %38 : vector<1x16x8xf32>
    %40 = math.exp %39 : vector<1x16x8xf32>
    %c0_26 = arith.constant 0 : index
    %c0_27 = arith.constant 0 : index
    %c0_28 = arith.constant 0 : index
    %41 = vector.load %arg10[%c0_26, %c0_27, %c0_28] : memref<1x1x8xf32, #tpu.memory_space<vmem>>, vector<1x1x8xf32>
    %42 = arith.mulf %37, %41 : vector<1x1x8xf32>
    %cst_29 = arith.constant dense<0.000000e+00> : vector<1x8xf32>
    %43 = vector.multi_reduction <add>, %40, %cst_29 [1] : vector<1x16x8xf32> to vector<1x8xf32>
    %44 = vector.shape_cast %43 : vector<1x8xf32> to vector<1x1x8xf32>
    %45 = arith.addf %42, %44 : vector<1x1x8xf32>
    %c0_30 = arith.constant 0 : index
    %c0_31 = arith.constant 0 : index
    %c0_32 = arith.constant 0 : index
    %46 = vector.load %arg10[%c0_30, %c0_31, %c0_32] : memref<1x1x8xf32, #tpu.memory_space<vmem>>, vector<1x1x8xf32>
    tpu.vector_store %arg10[%c0_30, %c0_31, %c0_32], %45 {strides = array<i32>} : memref<1x1x8xf32, #tpu.memory_space<vmem>>, vector<1x1x8xf32>,
    %c0_33 = arith.constant 0 : index
    %c0_34 = arith.constant 0 : index
    %c0_35 = arith.constant 0 : index
    %47 = vector.load %arg9[%c0_33, %c0_34, %c0_35] : memref<1x1x8xf32, #tpu.memory_space<vmem>>, vector<1x1x8xf32>
    tpu.vector_store %arg9[%c0_33, %c0_34, %c0_35], %35 {strides = array<i32>} : memref<1x1x8xf32, #tpu.memory_space<vmem>>, vector<1x1x8xf32>,
    %cst_36 = arith.constant dense<0.000000e+00> : vector<1x8x128xf32>
    %48 = tpu.matmul %40, %3, %cst_36 {dimension_numbers = #tpu.dot_dimension_numbers<[1], [1], [2], [2], [0, 0, 0, 2, 1, 2], [0], [0]>} : vector<1x16x8xf32>, vector<1x16x128xf32>, vector<1x8x128xf32> -> vector<1x8x128xf32>
    %49 = tpu.transpose %37, [0, 2, 1] : vector<1x1x8xf32> -> vector<1x8x1xf32>
    %c0_37 = arith.constant 0 : index
    %c0_38 = arith.constant 0 : index
    %c0_39 = arith.constant 0 : index
    %50 = vector.load %arg11[%c0_37, %c0_38, %c0_39] : memref<1x8x128xf32, #tpu.memory_space<vmem>>, vector<1x8x128xf32>
    %51 = vector.broadcast %49 : vector<1x8x1xf32> to vector<1x8x128xf32>
    %52 = arith.mulf %51, %50 : vector<1x8x128xf32>
    %53 = arith.addf %52, %48 : vector<1x8x128xf32>
    %c0_40 = arith.constant 0 : index
    %c0_41 = arith.constant 0 : index
    %c0_42 = arith.constant 0 : index
    %54 = vector.load %arg11[%c0_40, %c0_41, %c0_42] : memref<1x8x128xf32, #tpu.memory_space<vmem>>, vector<1x8x128xf32>
    tpu.vector_store %arg11[%c0_40, %c0_41, %c0_42], %53 {strides = array<i32>} : memref<1x8x128xf32, #tpu.memory_space<vmem>>, vector<1x8x128xf32>,
    %c0_i32_43 = arith.constant 0 : i32
    %55 = arith.cmpi eq, %arg1, %c0_i32_43 : i32
    %56 = arith.extui %55 : i1 to i32
    %c0_i32_44 = arith.constant 0 : i32
    %57 = arith.cmpi ne, %56, %c0_i32_44 : i32
    scf.if %57 {
      %c0_45 = arith.constant 0 : index
      %c0_46 = arith.constant 0 : index
      %c0_47 = arith.constant 0 : index
      %58 = vector.load %arg10[%c0_45, %c0_46, %c0_47] : memref<1x1x8xf32, #tpu.memory_space<vmem>>, vector<1x1x8xf32>
      %59 = tpu.reciprocal %58 : vector<1x1x8xf32> -> vector<1x1x8xf32>
      %c0_48 = arith.constant 0 : index
      %c0_49 = arith.constant 0 : index
      %c0_50 = arith.constant 0 : index
      %60 = vector.load %arg11[%c0_48, %c0_49, %c0_50] : memref<1x8x128xf32, #tpu.memory_space<vmem>>, vector<1x8x128xf32>
      %61 = tpu.transpose %59, [0, 2, 1] : vector<1x1x8xf32> -> vector<1x8x1xf32>
      %62 = vector.broadcast %61 : vector<1x8x1xf32> to vector<1x8x128xf32>
      %63 = arith.mulf %60, %62 : vector<1x8x128xf32>
      %c0_51 = arith.constant 0 : index
      %c0_52 = arith.constant 0 : index
      %c0_53 = arith.constant 0 : index
      %64 = vector.load %arg8[%c0_51, %c0_52, %c0_53] : memref<1x8x128xf32, #tpu.memory_space<vmem>>, vector<1x8x128xf32>
      tpu.vector_store %arg8[%c0_51, %c0_52, %c0_53], %63 {strides = array<i32>} : memref<1x8x128xf32, #tpu.memory_space<vmem>>, vector<1x8x128xf32>,
    } else {
    }
    return
  }
  func.func @transform_0(%arg0: i32, %arg1: i32) -> i32 {
    %c0_i32 = arith.constant 0 : i32
    %c0_i32_0 = arith.constant 0 : i32
    return %c0_i32 : i32
  }
  func.func @transform_1(%arg0: i32, %arg1: i32) -> (i32, i32, i32) {
    %c0_i32 = arith.constant 0 : i32
    %c0_i32_0 = arith.constant 0 : i32
    return %arg0, %arg1, %c0_i32 : i32, i32, i32
  }
  func.func @transform_2(%arg0: i32, %arg1: i32) -> (i32, i32, i32) {
    %c0_i32 = arith.constant 0 : i32
    %c0_i32_0 = arith.constant 0 : i32
    %c0_i32_1 = arith.constant 0 : i32
    return %arg0, %c0_i32, %c0_i32_0 : i32, i32, i32
  }
  func.func @transform_3(%arg0: i32, %arg1: i32) -> (i32, i32, i32) {
    %c0_i32 = arith.constant 0 : i32
    %c0_i32_0 = arith.constant 0 : i32
    return %arg0, %arg1, %c0_i32 : i32, i32, i32
  }
  func.func @transform_4(%arg0: i32, %arg1: i32) -> (i32, i32, i32) {
    %c0_i32 = arith.constant 0 : i32
    %c0_i32_0 = arith.constant 0 : i32
    %c0_i32_1 = arith.constant 0 : i32
    return %arg0, %c0_i32, %c0_i32_0 : i32, i32, i32
  }
  func.func @transform_5(%arg0: i32, %arg1: i32) -> (i32, i32, i32) {
    %c0_i32 = arith.constant 0 : i32
    %c0_i32_0 = arith.constant 0 : i32
    return %arg0, %arg1, %c0_i32 : i32, i32, i32
  }
  func.func @transform_6(%arg0: i32, %arg1: i32) -> (i32, i32, i32) {
    %c0_i32 = arith.constant 0 : i32
    %c0_i32_0 = arith.constant 0 : i32
    %c0_i32_1 = arith.constant 0 : i32
    return %arg0, %c0_i32, %c0_i32_0 : i32, i32, i32
  }
}

</mosaic_0001>

<bundles_post_ra>
// kernel: tpu_custom_call.1
= control target key start
LH: loop header
LB: loop body
LE: loop exit
PB: predicated region body
PF: predicated region fallthrough
CT: control target
= control target key end

     0   :  { %s1391_s0 = inlined_call_operand.<no memory space> [shape: f32[1], index: 0, kind: input, shape index: {}]   ;;  %s1392_s1 = inlined_call_operand.vmem [shape: f32[2,16,128], index: 1, kind: input, shape index: {}]   ;;  %s1393_s2 = inlined_call_operand.hbm [shape: f32[2,8,128], index: 2, kind: input, shape index: {}]   ;;  %s1394_s3 = inlined_call_operand.vmem [shape: f32[2,16,1], index: 3, kind: input, shape index: {}]   ;;  %s1395_s4 = inlined_call_operand.vmem [shape: f32[2,1,8], index: 4, kind: input, shape index: {}]   ;;  %s1396_s5 = inlined_call_operand.hbm [shape: f32[2,16,128], index: 5, kind: output, shape index: {0}]   ;;  %s1397_s6 = inlined_call_operand.hbm [shape: f32[2,8,128], index: 6, kind: output, shape index: {1}]  }
   0x1   :  { %12 = sst [smem:[#allocation5]] %s1391_s0 }
   0x2   :  { %13 = vsyncpa [#allocation7], 0 }
   0x3   :  { %15 = vsyncpa [#allocation7 + $0x1], 0 }
   0x4   :  { %16 = vsyncpa [#allocation8], 0 }
   0x5   :  { %18 = vsyncpa [#allocation8 + $0x1], 0 }
   0x6   :  { %19 = vsyncpa [#allocation11], 0 }
   0x7   :  { %21 = vsyncpa [#allocation11 + $0x1], 0  ;;  %s1220_s23 = smov 0   ;;  %s1222_s24 = smov 0  }
   0x8   :  { %s1224_s25 = smov 0   ;;  %s1226_s26 = smov 0  }
   0x9   :  { %s1228_s27 = smov 0   ;;  %s1230_s28 = smov 0  }
   0xa LB: > { %s913_s0 = sadd.s32 4294967295, %s1175_s28   ;;  %s914_s29 = sadd.s32 4294967294, %s1175_s28   ;;  %s1175_s28 = sphi %s1230_s28, %s27_s28   ;;  %s1171_s27 = sphi %s1228_s27, %s1410_s27   ;;  %s1167_s26 = sphi %s1226_s26, %s1409_s26   ;;  %s1163_s25 = sphi %s1224_s25, %s1408_s25   ;;  %s1159_s24 = sphi %s1222_s24, %s1407_s24   ;;  %s1155_s23 = sphi %s1220_s23, %s1406_s23  }
   0xb   : > { %s39_s30 = sadd.s32 1, %s1171_s27  ;;  %s95_s7 = sadd.s32 1, %s1163_s25 }
   0xc   : > { %p41_p0 = scmp.ge.s32.totalorder %s39_s30, 2  ;;  %p102_p1 = scmp.ne.s32.totalorder %s1163_s25, %s1159_s24 }
   0xd   : > { %p103_p2 = scmp.eq.s32.totalorder %s1175_s28, 0  ;;  %p108_p3 = scmp.ne.s32.totalorder %s1159_s24, %s1155_s23 }
   0xe   : > { %s1412_s30 = smov (%p41_p0, %s39_s30), 0  ;;  %p109_p5 = scmp.eq.s32.totalorder %s913_s0, 0 }
   0xf   : > { %p1261_p4 = por %p103_p2, %p102_p1  ;;  %s92_s9 = ssub.s32 %s1171_s27, %s1412_s30 }
  0x10   : > { %p188_p6 = scmp.eq.s32.totalorder %s913_s0, 1  ;;  %p93_p7 = scmp.eq.s32.totalorder %s92_s9, 0 }
  0x11   : > { %p1267_p8 = por %p109_p5, %p108_p3  ;;  %p194_p10 = scmp.eq.s32.totalorder %s914_s29, 1 }
  0x12   : > { %p1271_p9 = por %p188_p6, %p102_p1  ;;  %p916_p12 = scmp.ge.s32.totalorder %s1175_s28, 2 }
  0x13   : > { %s1276_s12 = scalar_select %p93_p7, %s1163_s25, %s95_s7  }
  0x14   : > { %p1278_p11 = por %p194_p10, %p108_p3  ;;  %p958_p13 = scmp.lt.s32.totalorder %s1175_s28, 2 }
  0x15   : > { %s256_s14 = sand.u32 1, %s1163_s25   ;;  %s918_s16 = sshll.u32 %s1171_s27, 3 }
  0x16   : > { %s917_s15 = sshll.u32 %s256_s14, 3  ;;  %s264_s19 = scalar_lea.hbm %s1393_s2, %s918_s16 }
  0x17   : > { %s260_s20 = scalar_lea.vmem [#allocation6], %s917_s15  ;;  %s266_s22 = sshll.u32 %s264_s19, 4  ;;  %s267_s22 = int_to_ptr.hbm [resolvable:$true] %s266_s22 }
  0x18   : > { %s268_s21 = sshll.u32 %s260_s20, 4  ;;  %p948_p0 = pnand %p958_p13, %p1261_p4  ;;  %s269_s21 = int_to_ptr.vmem [resolvable:$true] %s268_s21 }
  0x19   : > { %p919_p1 = scmp.ge.s32.totalorder %s1175_s28, 1  ;;  %p292_p2 = scmp.lt.s32.totalorder %s1175_s28, 3 }
  0x1a   : > { %s257_s0 = scalar_lea.sflag [#allocation7], %s256_s14 }
  0x1b   : > { %950 = dma.hbm_to_vmem [thread:$0]  (!%p948_p0), %s267_s22, 128, %s269_s21, %s257_s0  }
  0x1c   : > { %p293_p3 = pnand %p919_p1, %p292_p2 }
  0x1d   : > { %s1294_s29 = sand.u32 (!%p293_p3), 1, %s1159_s24  }
  0x1e   : > { %296 = sbr.rel (%p293_p3) target bundleno = 716 (0x2cc), region = 40  ;;  %s1398_s7 = sshll.u32 (!%p293_p3), %s1294_s29, 3 }
  0x1f   : > { %s299_s9 = scalar_lea.sflag (!%p293_p3), [#allocation7], %s1294_s29  ;;  %s302_s15 = scalar_lea.vmem (!%p293_p3), [#allocation6], %s1398_s7 }
  0x23   : > { %1142 = dma.done.wait (%p1267_p8), %s299_s9, 128  }
  0x24   : > { %1144 = vsyncadd (%p1267_p8), %s299_s9, 4294967168  ;;  %p359_p4 = scmp.lt.s32.totalorder %s1167_s26, 1  ;;  %v1177_v0 = vmov 0   ;;  %v392_v1 = vld [vmem:[%s302_s15] sm:$0xff]  ;;  %vm386_vm3 = vcmask 57344   ;;  %v1178_v10 = vmov -inf  }
  0x25   : > { %1013 = vset.pattern.permute.xlu0 %v1177_v0  ;;  %1014 = vset.pattern.permute.xlu2 %v1177_v0  ;;  %387 = vst.msk [vmem:[#allocation2] sm:$0x1] %vm386_vm3, %v1178_v10  ;;  %s416_s9 = sld [smem:[#allocation5]]  ;;  %v1179_v15 = vmov 0.0   ;;  %vm443_vm7 = vcmask 64512   ;;  %vm591_vm10 = vcmask 130048  }
  0x26   : > { %s360_s8 = scalar_select %p359_p4, %s1167_s26, 1  ;;  %408 = vmatpush.xpose.msra.mxu0 %v392_v1  ;;  %940 = vmatpush.xpose.msra.mxu3 %v392_v1  ;;  %388 = vst.msk [vmem:[#allocation3] sm:$0x1] %vm386_vm3, %v1179_v15 }
  0x27   : > { %513 = vmatpush.msra.mxu1 %v392_v1  ;;  %s921_s15 = sshll.u32 %s1294_s29, 4  ;;  %s939_s16 = sshll.u32 %s1167_s26, 4 }
  0x28   : > { %s937_s14 = sshll.u32 %s360_s8, 4  ;;  %s380_s18 = scalar_lea.vmem %s1395_s4, %s360_s8 }
  0x29   : > { %s366_s21 = scalar_lea.vmem %s1392_s1, %s937_s14  ;;  %s376_s10 = scalar_lea.vmem %s1394_s3, %s937_s14  ;;  %v424_v5 = vld [vmem:[%s380_s18] sm:$0x1] }
  0x2a   : > { %v390_v2 = vld [vmem:[%s366_s21] sm:$0xff]  ;;  %v391_v3 = vld [vmem:[%s366_s21 + $0x8] sm:$0xff]  ;;  %vm425_vm1 = vcmp.ne.f32.partialorder %v424_v5, 0.0  ;;  %s350_s8 = scalar_lea.vmem [#allocation9], %s921_s15  ;;  %s733_s19 = scalar_lea.hbm %s1396_s5, %s939_s16 }
  0x2b   : > { %v420_v4 = vld [vmem:[%s376_s10] sm:$0xff]  ;;  %609 = vmatpush.msra.mxu2 %v391_v3  ;;  %v436_v7 = vsel %vm425_vm1, 1, %v1177_v0  ;;  %409 = vmatmul.f32.vlgmr.msra.gmra.mxu0 %v390_v2  ;;  %v421_v8 = vld [vmem:[%s376_s10 + $0x8] sm:$0xff]  ;;  %v417_v14 = vstv %s416_s9  ;;  %s734_s14 = sshll.u32 %s350_s8, 4  ;;  %s736_s20 = sshll.u32 %s733_s19, 4  ;;  %s735_s14 = int_to_ptr.vmem [resolvable:$true] %s734_s14  ;;  %s737_s20 = int_to_ptr.hbm [resolvable:$true] %s736_s20 }
  0x2c   : > { %vm422_vm0 = vcmp.ne.f32.partialorder %v420_v4, 0.0  ;;  %412 = vmatmul.f32.vlgmr.msra.gmra.mxu3 %v391_v3  ;;  %vm423_vm2 = vcmp.ne.f32.partialorder %v421_v8, 0.0  ;;  %v437_v12 = vperm.slane %v436_v7, 0  ;;  %v523_v31 = vld [vmem:[#allocation2] sm:$0x1]  ;;  %s715_s21 = scalar_lea.sflag [#allocation8], %s1294_s29 }
  0x2d   : > { %v426_v6 = vsel %vm422_vm0, 1, %v1177_v0  ;;  %610 = vmatpush.msra.mxu2 %v390_v2  ;;  %v427_v9 = vsel %vm423_vm2, 1, %v1177_v0  ;;  %v544_v51 = vld [vmem:[#allocation3] sm:$0x1]  ;;  %s1075_s22 = sshra.s32 %s737_s20, 4  ;;  %s1081_s15 = scalar_lea.hbm %s1396_s5, 32  ;;  %s1076_s22 = int_to_ptr.hbm [resolvable:$true] %s1075_s22 }
  0x2e   : > { %429 = vperm.xlu0 %1013, %v426_v6   ;;  %vm1316_vm4 = vcmp.eq.s32.totalorder %v437_v12, 1  ;;  %s1077_s0 = scalar_lea.hbm %s1076_s22, 16  ;;  %p1082_p8 = scmp.lt.s32.totalorder %s1076_s22, %s1396_s5 }
  0x2f   : > { %p1078_p5 = scmp.ne.s32.totalorder %s1076_s22, %s1077_s0  ;;  %p1083_p10 = scmp.lt.s32.totalorder %s1081_s15, %s1077_s0 }
  0x31   : > { %p1079_p6 = pnand %p1078_p5, %p1271_p9  ;;  %p1084_p13 = por %p1083_p10, %p1082_p8 }
  0x33   : > { %p1080_p7 = pneg %p1079_p6 }
  0x35   : > { %p1085_p0 = pnand %p1084_p13, %p1080_p7 }
  0x36   : > { %432 = vperm.xlu0 %1013, %v427_v9  }
  0xa0   : > { %v430_v11 = vpop.permute.xlu0 %429 }
  0xa1   : > { %vm434_vm5 = vcmp.eq.s32.totalorder %v430_v11, 1 }
  0xa2   : > { %vm439_vm6 = vmand %vm434_vm5, %vm1316_vm4 }
  0xa8   : > { %v410_v16 = vpop.f32.mrf.mxu0  ;;  %v433_v18 = vpop.permute.xlu0 %432 }
  0xa9   : > { %v418_v17 = vmul.f32 %v417_v14, %v410_v16  ;;  %vm435_vm8 = vcmp.eq.s32.totalorder %v433_v18, 1 }
  0xaa   : > { %vm440_vm9 = vmand %vm435_vm8, %vm1316_vm4 }
  0xab   : > { %v441_v19 = vsel %vm439_vm6, %v418_v17, -10000000.0 }
  0xac   : > { %v444_v20 = vsel %vm443_vm7, %v441_v19, -inf }
  0xad   : > { %445 = vmax.xlane.f32.xlu1 %v444_v20 }
  0xaf   : > { %v413_v21 = vpop.f32.mrf.mxu3 }
  0xb0   : > { %v419_v22 = vmul.f32 %v417_v14, %v413_v21 }
  0xb2   : > { %v442_v23 = vsel %vm440_vm9, %v419_v22, -10000000.0 }
  0xb3   : > { %v447_v24 = vsel %vm443_vm7, %v442_v23, -inf }
  0xb4   : > { %v524_v25 = vmax.f32 %v444_v20, %v447_v24 }
  0xb5   : > { %448 = vmax.xlane.f32.xlu1 %v447_v24 }
  0xb6   : > { %v525_v26 = vrot.slane %v524_v25, 4 }
  0xb8   : > { %v526_v27 = vmax.f32 %v524_v25, %v525_v26 }
  0xba   : > { %v527_v28 = vrot.slane %v526_v27, 2 }
  0xbc   : > { %v528_v29 = vmax.f32 %v526_v27, %v527_v28 }
  0xbe   : > { %v529_v30 = vrot.slane %v528_v29, 1 }
  0xc0   : > { %v530_v32 = vmax.f32 %v528_v29, %v529_v30 }
  0xc2   : > { %v531_v33 = vmax.f32 %v523_v31, %v530_v32 }
  0xc4   : > { %v536_v34 = vperm.slane %v531_v33, 0  ;;  %558 = vst.msk [vmem:[#allocation2] sm:$0x1] %vm386_vm3, %v531_v33  ;;  %v532_v39 = vsub.f32 %v523_v31, %v531_v33 }
  0xc6   : > { %v538_v35 = vsub.f32 %v441_v19, %v536_v34  ;;  %v539_v36 = vsub.f32 %v442_v23, %v536_v34  ;;  %v533_v44 = vmul.f32 1.442695, %v532_v39 }
  0xc8   : > { %v540_v37 = vmul.f32 1.442695, %v538_v35  ;;  %v542_v38 = vmul.f32 1.442695, %v539_v36 }
  0xca   : > { %1015 = vpow2.f32 %v540_v37 }
  0xcb   : > { %1017 = vpow2.f32 %v542_v38 }
  0xcc   : > { %1019 = vpow2.f32 %v533_v44 }
  0xd0   : > { %v1016_v40 = vpop.eup %1015 }
  0xd1   : > { %v1018_v41 = vpop.eup %1017  ;;  %v546_v42 = vsel %vm443_vm7, %v1016_v40, 0.0  ;;  %559 = vxpose.xlu0.b32.start [1/2] (short) (narrow) %v1016_v40, 8 }
  0xd2   : > { %v547_v43 = vsel %vm443_vm7, %v1018_v41, 0.0  ;;  %v1020_v50 = vpop.eup %1019 }
  0xd3   : > { %v548_v45 = vadd.f32 %v547_v43, %v546_v42  ;;  %v545_v54 = vmul.f32 %v1020_v50, %v544_v51 }
  0xd5   : > { %v549_v46 = vrot.slane %v548_v45, 4 }
  0xd7   : > { %v550_v47 = vadd.f32 %v549_v46, %v548_v45 }
  0xd9   : > { %560 = vxpose.xlu0.b32.end [2/2] (short) (narrow) %v1018_v41, 8  ;;  %v551_v48 = vrot.slane %v550_v47, 2 }
  0xdb   : > { %v552_v49 = vadd.f32 %v551_v48, %v550_v47 }
  0xdd   : > { %v553_v52 = vrot.slane %v552_v49, 1 }
  0xdf   : > { %v554_v53 = vadd.f32 %v553_v52, %v552_v49 }
  0xe1   : > { %v555_v55 = vadd.f32 %v554_v53, %v545_v54 }
  0xe3   : > { %557 = vst.msk [vmem:[#allocation3] sm:$0x1] %vm386_vm3, %v555_v55 }
  0xea   : > { %v659_v4 = vld [vmem:[#allocation3] sm:$0x1] }
  0xeb   : > { %vm665_vm0 = vweird.f32 %v659_v4  ;;  %v671_v27 = vand.u32 2147483648, %v659_v4  ;;  %v669_v29 = vand.u32 2147483647, %v659_v4 }
  0xed   : > { %v672_v34 = vor.u32 1.1754944e-38, %v671_v27  ;;  %vm670_vm5 = vcmp.eq.f32.partialorder %v669_v29, 8.507059e+37 }
  0xef   : > { %615 = vxpose.xlu1.b32.start.end [1/1] (short) (narrow) %v1020_v50, 8 }
 0x120   : > { %v446_v56 = vpop.xlane.xlu1 %445 }
 0x121   : > { %v450_v57 = vsub.f32 %v441_v19, %v446_v56 }
 0x123   : > { %v452_v58 = vmul.f32 1.442695, %v450_v57 }
 0x125   : > { %1021 = vpow2.f32 %v452_v58 }
 0x128   : > { %v449_v59 = vpop.xlane.xlu1 %448 }
 0x129   : > { %v451_v60 = vsub.f32 %v442_v23, %v449_v59 }
 0x12b   : > { %v1022_v61 = vpop.eup %1021  ;;  %v454_v62 = vmul.f32 1.442695, %v451_v60 }
 0x12c   : > { %v456_v63 = vsel %vm443_vm7, %v1022_v61, 0.0 }
 0x12d   : > { %1023 = vpow2.f32 %v454_v62  ;;  %457 = vadd.xlane.f32.xlu2 %v456_v63 }
 0x12e   : > { %1025 = vrcp.f32 %v659_v4 }
 0x133   : > { %v1024_v0 = vpop.eup %1023 }
 0x134   : > { %v459_v1 = vsel %vm443_vm7, %v1024_v0, 0.0  ;;  %v1026_v6 = vpop.eup %1025 }
 0x135   : > { %460 = vadd.xlane.f32.xlu2 %v459_v1  ;;  %v661_v7 = vmul.f32 %v1026_v6, %v659_v4  ;;  %vm666_vm15 = vweird.f32 %v1026_v6 }
 0x136   : > { %vm667_vm2 = vmor %vm665_vm0, %vm666_vm15 }
 0x137   : > { %v662_v12 = vsub.f32 1.0, %v661_v7 }
 0x139   : > { %v663_v17 = vmul.f32 %v1026_v6, %v662_v12 }
 0x13b   : > { %v664_v25 = vadd.f32 %v1026_v6, %v663_v17 }
 0x13d   : > { %v668_v31 = vsel %vm667_vm2, %v1026_v6, %v664_v25 }
 0x13e   : > { %v673_v36 = vsel %vm670_vm5, %v672_v34, %v668_v31 }
 0x175   : > { %v575_v2 = vpop.trf.xlu0 }
 0x176   : > { %929 = vmatmul.msk.f32.vlgmr.msra.gmra.mxu2 %vm591_vm10, %v575_v2 }
 0x193   : > { %v631_v3 = vpop.trf.xlu1 }
 0x194   : > { %650 = vperm.xlu2 %1014, %v631_v3  }
 0x1a0   : > { %v458_v5 = vpop.xlane.xlu2 %457 }
 0x1a1   : > { %1027 = vrcp.f32 %v458_v5  ;;  %v473_v13 = vand.u32 2147483648, %v458_v5  ;;  %v471_v15 = vand.u32 2147483647, %v458_v5  ;;  %vm467_vm12 = vweird.f32 %v458_v5 }
 0x1a3   : > { %v474_v19 = vor.u32 1.1754944e-38, %v473_v13  ;;  %vm472_vm14 = vcmp.eq.f32.partialorder %v471_v15, 8.507059e+37 }
 0x1a7   : > { %v1028_v8 = vpop.eup %1027 }
 0x1a8   : > { %v463_v9 = vmul.f32 %v1028_v8, %v458_v5  ;;  %v461_v10 = vpop.xlane.xlu2 %460  ;;  %vm468_vm11 = vweird.f32 %v1028_v8 }
 0x1a9   : > { %1029 = vrcp.f32 %v461_v10  ;;  %vm469_vm13 = vmor %vm467_vm12, %vm468_vm11  ;;  %v487_v26 = vand.u32 2147483648, %v461_v10  ;;  %v485_v30 = vand.u32 2147483647, %v461_v10  ;;  %vm481_vm3 = vweird.f32 %v461_v10 }
 0x1aa   : > { %v464_v11 = vsub.f32 1.0, %v463_v9 }
 0x1ab   : > { %v488_v33 = vor.u32 1.1754944e-38, %v487_v26  ;;  %vm486_vm6 = vcmp.eq.f32.partialorder %v485_v30, 8.507059e+37 }
 0x1ac   : > { %v465_v14 = vmul.f32 %v1028_v8, %v464_v11 }
 0x1ae   : > { %v466_v16 = vadd.f32 %v1028_v8, %v465_v14 }
 0x1af   : > { %v1030_v18 = vpop.eup %1029 }
 0x1b0   : > { %v477_v20 = vmul.f32 %v1030_v18, %v461_v10  ;;  %v470_v21 = vsel %vm469_vm13, %v1028_v8, %v466_v16  ;;  %vm482_vm1 = vweird.f32 %v1030_v18 }
 0x1b1   : > { %v475_v22 = vsel %vm472_vm14, %v474_v19, %v470_v21  ;;  %vm483_vm4 = vmor %vm481_vm3, %vm482_vm1 }
 0x1b2   : > { %v478_v23 = vsub.f32 1.0, %v477_v20  ;;  %v490_v24 = vmul.f32 %v1022_v61, %v475_v22 }
 0x1b4   : > { %v479_v28 = vmul.f32 %v1030_v18, %v478_v23  ;;  %927 = vmatmul.msk.f32.vlgmr.msra.gmra.mxu1 %vm443_vm7, %v490_v24 }
 0x1b6   : > { %v480_v32 = vadd.f32 %v1030_v18, %v479_v28 }
 0x1b8   : > { %v484_v35 = vsel %vm483_vm4, %v1030_v18, %v480_v32 }
 0x1b9   : > { %v489_v37 = vsel %vm486_vm6, %v488_v33, %v484_v35 }
 0x1ba   : > { %675 = vxpose.xlu2.b32.start.end [1/1] (short) (narrow) %v673_v36, 8  ;;  %v491_v38 = vmul.f32 %v1024_v0, %v489_v37 }
 0x1bc   : > { %928 = vmatmul.msk.f32.gmra.mxu1 %vm443_vm7, %v491_v38 }
 0x1ee   : > { %v651_v41 = vpop.permute.xlu2 %650 }
 0x231   : > { %v515_v39 = vpop.f32.mrf.mxu1 }
 0x232   : > { %521 = vst [vmem:[%s350_s8] sm:$0xff] %v515_v39 }
 0x239   : > { %v518_v40 = vpop.f32.mrf.mxu1 }
 0x23a   : > { %522 = vst [vmem:[%s350_s8 + $0x8] sm:$0xff] %v518_v40 }
 0x23b   : > { %1088 = shalt.err (!%p1085_p0)
}
 0x23c   : > { %s1180_s16 = smov 128   ;;  %s1181_s17 = smov 8   ;;  %v612_v43 = vpop.f32.mrf.mxu2  ;;  %v653_v44 = vmul.f32 0.0, %v651_v41 }
 0x23d   : > { %943 = dma.vmem_to_hbm [thread:$0]  (%p1271_p9), %s735_s14, 256, %s737_s20, %s715_s21, %s1180_s16, %s1180_s16, %s1181_s17  }
 0x23e   : > { %s934_s18 = sshll.u32 %s1167_s26, 3  ;;  %s1405_s22 = sshll.u32 %s1294_s29, 3  ;;  %v654_v45 = vadd.f32 %v653_v44, %v612_v43 }
 0x23f   : > { %s749_s7 = scalar_lea.hbm %s1397_s6, %s934_s18  ;;  %s357_s0 = scalar_lea.vmem [#allocation10], %s1405_s22 }
 0x240   : > { %s751_s9 = sshll.u32 %s357_s0, 4  ;;  %s753_s15 = sshll.u32 %s749_s7, 4  ;;  %s752_s9 = int_to_ptr.vmem [resolvable:$true] %s751_s9  ;;  %s754_s15 = int_to_ptr.hbm [resolvable:$true] %s753_s15 }
 0x241   : > { %s720_s14 = scalar_lea.sflag [#allocation11], %s1294_s29  ;;  %s1103_s20 = sshra.s32 %s754_s15, 4  ;;  %s1104_s20 = int_to_ptr.hbm [resolvable:$true] %s1103_s20 }
 0x242   : > { %s1105_s26 = scalar_lea.hbm %s1104_s20, 8  ;;  %s1109_s16 = scalar_lea.hbm %s1397_s6, 16 }
 0x243   : > { %p1106_p1 = scmp.ne.s32.totalorder %s1104_s20, %s1105_s26  ;;  %p1110_p4 = scmp.lt.s32.totalorder %s1104_s20, %s1397_s6 }
 0x244   : > { %p1111_p5 = scmp.lt.s32.totalorder %s1109_s16, %s1105_s26 }
 0x245   : > { %p1107_p2 = pnand %p1106_p1, %p1271_p9 }
 0x246   : > { %p1112_p6 = por %p1111_p5, %p1110_p4 }
 0x247   : > { %p1108_p3 = pneg %p1107_p2 }
 0x249   : > { %p1113_p7 = pnand %p1112_p6, %p1108_p3 }
 0x253   : > { %v691_v42 = vpop.trf.xlu2 }
 0x254   : > { %709 = vperm.xlu0 %1013, %v691_v42  }
 0x2c6   : > { %v710_v46 = vpop.permute.xlu0 %709 }
 0x2c7   : > { %v712_v47 = vmul.f32 %v710_v46, %v654_v45 }
 0x2c9   : > { %713 = vst [vmem:[%s357_s0] sm:$0xff] %v712_v47 }
 0x2ca   : > { %1116 = shalt.err (!%p1113_p7)
}
 0x2cb   : > { %944 = dma.vmem_to_hbm [thread:$0]  (%p1271_p9), %s752_s9, 128, %s754_s15, %s720_s14  }
 0x2cc PF: > { %s765_s29 = sand.u32 1, %s1155_s23   ;;  %p952_p8 = pnand %p916_p12, %p1278_p11 }
 0x2cd   : > { %s766_s19 = scalar_lea.sflag [#allocation8], %s765_s29 }
 0x2ce   : > { %p953_p10 = pneg %p952_p8 }
 0x2d0   : > { %1146 = dma.done.wait (%p953_p10), %s766_s19, 256  }
 0x2d1   : > { %1148 = vsyncadd (%p953_p10), %s766_s19, 4294967040  ;;  %s776_s10 = scalar_lea.sflag [#allocation11], %s765_s29 }
 0x2d2   : > { %1150 = dma.done.wait (%p953_p10), %s776_s10, 128  }
 0x2d3   : > { %1152 = vsyncadd (%p953_p10), %s776_s10, 4294967168  ;;  %s27_s28 = sadd.s32 1, %s1175_s28   ;;  %s1406_s23 = smov %s1159_s24 }
 0x2d4   : > { %p24_p13 = scmp.ge.s32.totalorder %s27_s28, 4   ;;  %s1407_s24 = smov %s1163_s25 }
 0x2d5   : > { %s1408_s25 = smov %s1276_s12  ;;  %s1409_s26 = smov %s1171_s27 }
 0x2d6   : > { %s1410_s27 = smov %s1412_s30  ;;  %26 = sbr.rel (!%p24_p13) target bundleno = 10 (0xa), region = 119 }
 0x2db   :  { %782 = vsyncpa [#allocation7], 1 }
 0x2dc   :  { %784 = vsyncpa [#allocation7 + $0x1], 1 }
 0x2dd   :  { %785 = vsyncpa [#allocation8], 1 }
 0x2de   :  { %787 = vsyncpa [#allocation8 + $0x1], 1 }
 0x2df   :  { %788 = vsyncpa [#allocation11], 1 }
 0x2e0   :  { %790 = vsyncpa [#allocation11 + $0x1], 1 }

</bundles_post_ra>
